<compile_context>
chip_gen: v7x
topology: tpu7x:2x2x1
jax: 0.10.0
libtpu: 0.0.40
codegen_flags: <defaults>
</compile_context>

<pallas_src>
import jax
import jax.numpy as jnp
from jax.experimental import pallas as pl
from jax.experimental.pallas import tpu as pltpu


def _round_up(x, m):
    return (x + m - 1) // m * m


def prefix_mlp_kernel(x_ref, w1_ref, b1_ref, w2_ref, b2_ref, o_ref, h_ref):
    """One (tm, tn) output tile of tanh(x @ W1 + b1) @ W2 + b2.

    Grid = (M_pad // tm, O // tn); grid axis 1 (j) streams W2 column tiles and
    is the fastest-varying axis, so the small first GEMM + tanh runs once per
    M-tile, is cached in VMEM scratch, and reused for every W2 tile.
    """
    @pl.when(pl.program_id(1) == 0)
    def _():
        h = jnp.dot(x_ref[...].astype(jnp.float32),
                    w1_ref[...].astype(jnp.float32),
                    preferred_element_type=jnp.float32)
        h = h + b1_ref[...].astype(jnp.float32)      # (1, P) broadcasts to (tm, P)
        h_ref[...] = jnp.tanh(h)                     # EUP; keep f32 (v5e-safe)

    # Second GEMM: stream W2 (P, tn) tiles through the MXU. Cast the cached h
    # to W2's dtype immediately before the dot (bf16-friendly), accumulate f32.
    h = h_ref[...].astype(w2_ref.dtype)
    y = jnp.dot(h, w2_ref[...], preferred_element_type=jnp.float32)
    y = y + b2_ref[...].astype(jnp.float32)
    o_ref[...] = y.astype(o_ref.dtype)


def _pick_tiles(rows, O, P, w2_itemsize, *, tm_max=256,
                w2_tile_budget=24 * 2**20):
    """Choose (tm, tn): tm multiple of 8 sublanes, tn lane-dense multiple of
    128 dividing O, with the double-buffered W2 stream sized for v7x VMEM."""
    tm = min(_round_up(rows, 8), tm_max)
    if O % 128 == 0:
        tn = 128
        for cand in (4096, 2048, 1024, 512, 256):
            if O % cand == 0 and 2 * P * cand * w2_itemsize <= w2_tile_budget:
                tn = cand
                break
    else:
        tn = O  # odd small O: full-array block is still legal
    return tm, tn


def prefix_encoder_forward(prefix, embedding, w1, b1, w2, b2, *,
                           shared_prefix=False):
    """prefix: int32 (B, L); returns (B, L, O) with O = 2*layers*hidden.

    Weights are stored as (in_features, out_features) so y = x @ W + b matches
    torch.nn.Linear numerically. Set shared_prefix=True only when every batch
    row uses identical prefix ids (the standard p-tuning v2 setup).
    """
    B, L = prefix.shape
    H = embedding.shape[1]
    P = w1.shape[1]
    O = w2.shape[1]
    out_dtype = embedding.dtype

    if shared_prefix:
        # Batch-invariant fast path: MLP for L rows only, broadcast over B.
        x = jnp.take(embedding, prefix[0].reshape(-1), axis=0)       # (L, H)
        rows = L
    else:
        x = jnp.take(embedding, prefix.reshape(-1), axis=0)          # (B*L, H)
        rows = B * L

    w2_itemsize = jnp.dtype(w2.dtype).itemsize
    tm, tn = _pick_tiles(rows, O, P, w2_itemsize)
    M_pad = _round_up(rows, tm)
    if M_pad != rows:
        x = jnp.pad(x, ((0, M_pad - rows), (0, 0)))
    grid = (M_pad // tm, O // tn)

    # Rough VMEM footprint: double-buffered streams + resident W1/b1 + scratch.
    def _isz(a):
        return jnp.dtype(a.dtype).itemsize

    est = (2 * (tm * H * _isz(x) + P * tn * w2_itemsize + tn * _isz(b2)
                + tm * tn * jnp.dtype(out_dtype).itemsize)
           + 2 * (H * P * _isz(w1) + P * _isz(b1))
           + 4 * tm * P)
    # Explicit scoped-VMEM limit (v5e default is only 16 MiB); cap at v7x's
    # 64 MiB physical VMEM so the same code ports across generations.
    vmem_limit = int(min(max(2 * est, 32 * 2**20), 64 * 2**20))

    cost = pl.CostEstimate(
        flops=2 * M_pad * H * P + 2 * M_pad * P * O,
        transcendentals=M_pad * P,
        bytes_accessed=int(x.size * _isz(x) + w1.size * _isz(w1)
                           + b1.size * _isz(b1) + w2.size * w2_itemsize
                           + b2.size * _isz(b2)
                           + M_pad * O * jnp.dtype(out_dtype).itemsize),
    )

    out = pl.pallas_call(
        prefix_mlp_kernel,
        out_shape=jax.ShapeDtypeStruct((M_pad, O), out_dtype),
        grid=grid,
        in_specs=[
            pl.BlockSpec((tm, H), lambda i, j: (i, 0)),   # x: new tile per i
            pl.BlockSpec((H, P), lambda i, j: (0, 0)),    # W1: resident
            pl.BlockSpec((1, P), lambda i, j: (0, 0)),    # b1: resident
            pl.BlockSpec((P, tn), lambda i, j: (0, j)),   # W2: streamed over j
            pl.BlockSpec((1, tn), lambda i, j: (0, j)),   # b2: streamed over j
        ],
        out_specs=pl.BlockSpec((tm, tn), lambda i, j: (i, j)),
        scratch_shapes=[pltpu.VMEM((tm, P), jnp.float32)],  # cached tanh(x@W1+b1)
        compiler_params=pltpu.CompilerParams(
            dimension_semantics=("parallel", "arbitrary"),
            vmem_limit_bytes=vmem_limit),
        cost_estimate=cost,
    )(x, w1, b1, w2, b2)

    out = out[:rows]
    if shared_prefix:
        return jnp.broadcast_to(out.reshape(1, L, O), (B, L, O))
    return out.reshape(B, L, O)


if __name__ == "__main__":
    # Small config consistent with the module's __init__.
    batch = 2
    pre_seq_len = 8            # prefix length == embedding vocab size
    hidden = 32                # config.hidden_size
    prefix_hidden = 64         # prefix_hidden_size
    num_layers = 2             # config.num_hidden_layers
    out_dim = num_layers * 2 * hidden   # 128

    key = jax.random.PRNGKey(0)
    k_emb, k_w1, k_b1, k_w2, k_b2, k_idx = jax.random.split(key, 6)

    embedding = jax.random.normal(k_emb, (pre_seq_len, hidden), jnp.float32)
    w1 = jax.random.normal(k_w1, (hidden, prefix_hidden), jnp.float32) * 0.1
    b1 = jax.random.normal(k_b1, (1, prefix_hidden), jnp.float32) * 0.1
    w2 = jax.random.normal(k_w2, (prefix_hidden, out_dim), jnp.float32) * 0.1
    b2 = jax.random.normal(k_b2, (1, out_dim), jnp.float32) * 0.1

    prefix = jax.random.randint(k_idx, (batch, pre_seq_len), 0, pre_seq_len,
                                dtype=jnp.int32)

    # 1) General path (arbitrary per-batch prefix ids), f32 end-to-end.
    out = prefix_encoder_forward(prefix, embedding, w1, b1, w2, b2)
    out = jax.block_until_ready(out)

    x_flat = jnp.take(embedding, prefix.reshape(-1), axis=0)
    ref = (jnp.tanh(x_flat @ w1 + b1) @ w2 + b2).reshape(batch, pre_seq_len, out_dim)
    assert out.shape == (batch, pre_seq_len, out_dim)
    assert jnp.allclose(out, ref, atol=1e-5, rtol=1e-5)

    # 2) bf16 W2 stream (bandwidth path) with f32 accumulation — loose tol.
    out_bf = prefix_encoder_forward(prefix, embedding, w1, b1,
                                    w2.astype(jnp.bfloat16), b2)
    out_bf = jax.block_until_ready(out_bf)
    assert jnp.allclose(out_bf, ref, atol=5e-2, rtol=5e-2)

    # 3) Shared-prefix fast path (p-tuning v2's arange prefix broadcast over B).
    prefix_shared = jnp.tile(jnp.arange(pre_seq_len, dtype=jnp.int32)[None, :],
                             (batch, 1))
    out_sh = prefix_encoder_forward(prefix_shared, embedding, w1, b1, w2, b2,
                                    shared_prefix=True)
    out_sh = jax.block_until_ready(out_sh)
    x_sh = jnp.take(embedding, prefix_shared.reshape(-1), axis=0)
    ref_sh = (jnp.tanh(x_sh @ w1 + b1) @ w2 + b2).reshape(batch, pre_seq_len,
                                                          out_dim)
    assert jnp.allclose(out_sh, ref_sh, atol=1e-5, rtol=1e-5)

    print("KERNEL_OK")
</pallas_src>

<mosaic_0001>
module attributes {stable_mosaic.version = 11 : i64} {
  func.func @prefix_mlp_kernel(%arg0: i32, %arg1: i32, %arg2: memref<16x32xf32, #tpu.memory_space<vmem>>, %arg3: memref<32x64xf32, #tpu.memory_space<vmem>>, %arg4: memref<1x64xf32, #tpu.memory_space<vmem>>, %arg5: memref<64x128xf32, #tpu.memory_space<vmem>>, %arg6: memref<1x128xf32, #tpu.memory_space<vmem>>, %arg7: memref<16x128xf32, #tpu.memory_space<vmem>>, %arg8: memref<16x64xf32, #tpu.memory_space<vmem>>) attributes {dimension_semantics = [#tpu.dimension_semantics<parallel>, #tpu.dimension_semantics<arbitrary>], iteration_bounds = array<i64: 1, 1>, scalar_prefetch = 0 : i64, scratch_operands = 1 : i64, tpu.core_type = #tpu.core_type<tc>, window_params = [{transform_indices = @transform_0, window_bounds = array<i64: 16, 32>}, {pipeline_mode = #tpu.pipeline_mode<synchronous>, transform_indices = @transform_1, window_bounds = array<i64: 32, 64>}, {pipeline_mode = #tpu.pipeline_mode<synchronous>, transform_indices = @transform_2, window_bounds = array<i64: 1, 64>}, {transform_indices = @transform_3, window_bounds = array<i64: 64, 128>}, {transform_indices = @transform_4, window_bounds = array<i64: 1, 128>}, {transform_indices = @transform_5, window_bounds = array<i64: 16, 128>}]} {
    %c0_i32 = arith.constant 0 : i32
    %0 = arith.cmpi eq, %arg1, %c0_i32 : i32
    %1 = arith.extui %0 : i1 to i32
    %c0_i32_0 = arith.constant 0 : i32
    %2 = arith.cmpi ne, %1, %c0_i32_0 : i32
    scf.if %2 {
      %c0_8 = arith.constant 0 : index
      %c0_9 = arith.constant 0 : index
      %10 = vector.load %arg2[%c0_8, %c0_9] : memref<16x32xf32, #tpu.memory_space<vmem>>, vector<16x32xf32>
      %c0_10 = arith.constant 0 : index
      %c0_11 = arith.constant 0 : index
      %11 = vector.load %arg3[%c0_10, %c0_11] : memref<32x64xf32, #tpu.memory_space<vmem>>, vector<32x64xf32>
      %cst_12 = arith.constant dense<0.000000e+00> : vector<16x64xf32>
      %12 = tpu.matmul %10, %11, %cst_12 {dimension_numbers = #tpu.dot_dimension_numbers<[1], [0], [0], [1], [0, 0, 1, 1], [], []>} : vector<16x32xf32>, vector<32x64xf32>, vector<16x64xf32> -> vector<16x64xf32>
      %c0_13 = arith.constant 0 : index
      %c0_14 = arith.constant 0 : index
      %13 = vector.load %arg4[%c0_13, %c0_14] : memref<1x64xf32, #tpu.memory_space<vmem>>, vector<1x64xf32>
      %14 = vector.broadcast %13 : vector<1x64xf32> to vector<16x64xf32>
      %15 = arith.addf %12, %14 : vector<16x64xf32>
      %16 = math.tanh %15 : vector<16x64xf32>
      %c0_15 = arith.constant 0 : index
      %c0_16 = arith.constant 0 : index
      %17 = vector.load %arg8[%c0_15, %c0_16] : memref<16x64xf32, #tpu.memory_space<vmem>>, vector<16x64xf32>
      tpu.vector_store %arg8[%c0_15, %c0_16], %16 {strides = array<i32>} : memref<16x64xf32, #tpu.memory_space<vmem>>, vector<16x64xf32>,
    } else {
    }
    %c0 = arith.constant 0 : index
    %c0_1 = arith.constant 0 : index
    %3 = vector.load %arg8[%c0, %c0_1] : memref<16x64xf32, #tpu.memory_space<vmem>>, vector<16x64xf32>
    %c0_2 = arith.constant 0 : index
    %c0_3 = arith.constant 0 : index
    %4 = vector.load %arg5[%c0_2, %c0_3] : memref<64x128xf32, #tpu.memory_space<vmem>>, vector<64x128xf32>
    %cst = arith.constant dense<0.000000e+00> : vector<16x128xf32>
    %5 = tpu.matmul %3, %4, %cst {dimension_numbers = #tpu.dot_dimension_numbers<[1], [0], [0], [1], [0, 0, 1, 1], [], []>} : vector<16x64xf32>, vector<64x128xf32>, vector<16x128xf32> -> vector<16x128xf32>
    %c0_4 = arith.constant 0 : index
    %c0_5 = arith.constant 0 : index
    %6 = vector.load %arg6[%c0_4, %c0_5] : memref<1x128xf32, #tpu.memory_space<vmem>>, vector<1x128xf32>
    %7 = vector.broadcast %6 : vector<1x128xf32> to vector<16x128xf32>
    %8 = arith.addf %5, %7 : vector<16x128xf32>
    %c0_6 = arith.constant 0 : index
    %c0_7 = arith.constant 0 : index
    %9 = vector.load %arg7[%c0_6, %c0_7] : memref<16x128xf32, #tpu.memory_space<vmem>>, vector<16x128xf32>
    tpu.vector_store %arg7[%c0_6, %c0_7], %8 {strides = array<i32>} : memref<16x128xf32, #tpu.memory_space<vmem>>, vector<16x128xf32>,
    return
  }
  func.func @transform_0(%arg0: i32, %arg1: i32) -> (i32, i32) {
    %c0_i32 = arith.constant 0 : i32
    %c0_i32_0 = arith.constant 0 : i32
    return %arg0, %c0_i32 : i32, i32
  }
  func.func @transform_1(%arg0: i32, %arg1: i32) -> (i32, i32) {
    %c0_i32 = arith.constant 0 : i32
    %c0_i32_0 = arith.constant 0 : i32
    %c0_i32_1 = arith.constant 0 : i32
    return %c0_i32, %c0_i32_0 : i32, i32
  }
  func.func @transform_2(%arg0: i32, %arg1: i32) -> (i32, i32) {
    %c0_i32 = arith.constant 0 : i32
    %c0_i32_0 = arith.constant 0 : i32
    %c0_i32_1 = arith.constant 0 : i32
    return %c0_i32, %c0_i32_0 : i32, i32
  }
  func.func @transform_3(%arg0: i32, %arg1: i32) -> (i32, i32) {
    %c0_i32 = arith.constant 0 : i32
    %c0_i32_0 = arith.constant 0 : i32
    return %c0_i32, %arg1 : i32, i32
  }
  func.func @transform_4(%arg0: i32, %arg1: i32) -> (i32, i32) {
    %c0_i32 = arith.constant 0 : i32
    %c0_i32_0 = arith.constant 0 : i32
    return %c0_i32, %arg1 : i32, i32
  }
  func.func @transform_5(%arg0: i32, %arg1: i32) -> (i32, i32) {
    %c0_i32 = arith.constant 0 : i32
    return %arg0, %arg1 : i32, i32
  }
}

</mosaic_0001>

<bundles_post_ra>
// kernel: tpu_custom_call.1
= control target key start
LH: loop header
LB: loop body
LE: loop exit
PB: predicated region body
PF: predicated region fallthrough
CT: control target
= control target key end

     0   :  { %10 = vsyncpa [#allocation4], 0  ;;  %s574_s0 = inlined_call_operand.hbm [shape: f32[16,32], index: 0, kind: input, shape index: {}]   ;;  %s575_s1 = inlined_call_operand.hbm [shape: f32[32,64], index: 1, kind: input, shape index: {}]   ;;  %s576_s2 = inlined_call_operand.vmem [shape: f32[1,64], index: 2, kind: input, shape index: {}]   ;;  %s577_s3 = inlined_call_operand.hbm [shape: f32[64,128], index: 3, kind: input, shape index: {}]   ;;  %s578_s4 = inlined_call_operand.vmem [shape: f32[1,128], index: 4, kind: input, shape index: {}]   ;;  %s579_s5 = inlined_call_operand.hbm [shape: f32[16,128], index: 5, kind: output, shape index: {}]  }
   0x1   :  { %11 = vsyncpa [#allocation7], 0 }
   0x2   :  { %12 = vsyncpa [#allocation5], 0  ;;  %s465_s18 = smov [#allocation6]   ;;  %s466_s20 = smov [#allocation3]  }
   0x3   :  { %s30_s19 = sshll.u32 %s465_s18, 4  ;;  %s18_s21 = sshll.u32 %s466_s20, 4  ;;  %s31_s19 = int_to_ptr.vmem [resolvable:$true] %s30_s19  ;;  %s501_s21 = int_to_ptr.vmem [resolvable:$true] %s18_s21 }
   0x4   :  { %s371_s24 = scalar_lea.hbm %s575_s1, 512 }
   0x5   :  { %p372_p0 = scmp.ne.s32.totalorder %s575_s1, %s371_s24  ;;  %p375_p1 = scmp.lt.u32.totalorder %s371_s24, %s575_s1 }
   0x7   :  { %p377_p2 = pnand %p375_p1, %p372_p0 }
   0x9   :  { %380 = shalt.err (!%p377_p2)
}
   0xa   :  { %s381_s29 = scalar_lea.vmem %s31_s19, 512  ;;  %p386_p4 = scmp.lt.s32.totalorder %s31_s19, %s31_s19 }
   0xb   :  { %p382_p3 = scmp.ne.s32.totalorder %s31_s19, %s381_s29  ;;  %p387_p5 = scmp.lt.s32.totalorder %s381_s29, %s381_s29 }
   0xd   :  { %p388_p6 = por %p387_p5, %p386_p4 }
   0xf   :  { %p389_p7 = pnand %p388_p6, %p382_p3 }
  0x11   :  { %392 = shalt.err (!%p389_p7)
}
  0x12   :  { %s467_s30 = smov 128   ;;  %s468_s6 = smov 8  }
  0x13   :  { %36 = dma.hbm_to_vmem [thread:$0]  %s575_s1, 512, %s31_s19, [#allocation7], %s467_s30, %s467_s30, %s468_s6  }
  0x14   :  { %s393_s11 = scalar_lea.hbm %s574_s0, 256 }
  0x15   :  { %p394_p8 = scmp.ne.s32.totalorder %s574_s0, %s393_s11  ;;  %p397_p9 = scmp.lt.u32.totalorder %s393_s11, %s574_s0 }
  0x17   :  { %p399_p10 = pnand %p397_p9, %p394_p8 }
  0x19   :  { %402 = shalt.err (!%p399_p10)
}
  0x1a   :  { %s403_s16 = scalar_lea.vmem %s501_s21, 256  ;;  %p408_p12 = scmp.lt.s32.totalorder %s501_s21, %s501_s21 }
  0x1b   :  { %p404_p11 = scmp.ne.s32.totalorder %s501_s21, %s403_s16  ;;  %p409_p13 = scmp.lt.s32.totalorder %s403_s16, %s403_s16 }
  0x1d   :  { %p410_p0 = por %p409_p13, %p408_p12 }
  0x1f   :  { %p411_p1 = pnand %p410_p0, %p404_p11 }
  0x21   :  { %414 = shalt.err (!%p411_p1)
}
  0x22   :  { %24 = dma.hbm_to_vmem [thread:$0]  %s574_s0, 256, %s501_s21, [#allocation4], %s467_s30, %s467_s30, %s468_s6  }
  0x23   :  { %s469_s18 = smov [#allocation8]   ;;  %s415_s23 = scalar_lea.hbm %s577_s3, 1024 }
  0x24   :  { %s44_s19 = sshll.u32 %s469_s18, 4  ;;  %p416_p2 = scmp.ne.s32.totalorder %s577_s3, %s415_s23  ;;  %s45_s19 = int_to_ptr.vmem [resolvable:$true] %s44_s19 }
  0x25   :  { %p419_p3 = scmp.lt.u32.totalorder %s415_s23, %s577_s3 }
  0x27   :  { %p421_p4 = pnand %p419_p3, %p416_p2 }
  0x29   :  { %424 = shalt.err (!%p421_p4)
}
  0x2a   :  { %s425_s28 = scalar_lea.vmem %s45_s19, 1024  ;;  %p430_p6 = scmp.lt.s32.totalorder %s45_s19, %s45_s19 }
  0x2b   :  { %p426_p5 = scmp.ne.s32.totalorder %s45_s19, %s425_s28  ;;  %p431_p7 = scmp.lt.s32.totalorder %s425_s28, %s425_s28 }
  0x2d   :  { %p432_p8 = por %p431_p7, %p430_p6 }
  0x2f   :  { %p433_p9 = pnand %p432_p8, %p426_p5 }
  0x31   :  { %436 = shalt.err (!%p433_p9)
}
  0x32   :  { %50 = dma.hbm_to_vmem [thread:$0]  %s577_s3, 1024, %s45_s19, [#allocation7], %s467_s30, %s467_s30, %s468_s6  }
  0x33   :  { %459 = dma.done.wait [#allocation4], 256  }
  0x34   :  { %460 = vsyncadd [#allocation4], 4294967040 }
  0x35   :  { %461 = dma.done.wait [#allocation7], 1536  }
  0x36   :  { %462 = vsyncadd [#allocation7], 4294965760  ;;  %vm79_vm0 = vcmask 261120   ;;  %v68_v0 = vld [vmem:[#allocation6] sm:$0xff]  ;;  %v69_v1 = vld [vmem:[#allocation6 + $0x8] sm:$0xff]  ;;  %vm163_vm1 = vcmask 523264  }
  0x37   :  { %v70_v2 = vld [vmem:[#allocation6 + $0x10] sm:$0xff]  ;;  %v337_v3 = vpack.c.bf16 %v69_v1, %v68_v0  ;;  %v71_v4 = vld [vmem:[#allocation6 + $0x18] sm:$0xff]  ;;  %v168_v8 = vld [vmem:[#allocation8] sm:$0xff] }
  0x38   :  { %v66_v5 = vld [vmem:[#allocation3] sm:$0xff]  ;;  %v341_v6 = vpack.c.bf16 %v71_v4, %v70_v2  ;;  %v67_v7 = vld [vmem:[#allocation3 + $0x8] sm:$0xff]  ;;  %v169_v9 = vld [vmem:[#allocation8 + $0x8] sm:$0xff] }
  0x39   :  { %315 = vmatprep.mubr.msk.f32.mxu0 %vm79_vm0, %v66_v5  ;;  %338 = vmatprep.subr.bf16.mxu0 %v337_v3  ;;  %v170_v10 = vld [vmem:[#allocation8 + $0x10] sm:$0xff]  ;;  %v345_v11 = vpack.c.bf16 %v169_v9, %v168_v8  ;;  %v171_v12 = vld [vmem:[#allocation8 + $0x18] sm:$0xff]  ;;  %v172_v14 = vld [vmem:[#allocation8 + $0x20] sm:$0xff] }
  0x3a   :  { %340 = vmatpush3.bf16.msra.mxu0 %v337_v3  ;;  %v349_v13 = vpack.c.bf16 %v171_v12, %v170_v10  ;;  %v173_v15 = vld [vmem:[#allocation8 + $0x28] sm:$0xff]  ;;  %v174_v17 = vld [vmem:[#allocation8 + $0x30] sm:$0xff]  ;;  %v175_v18 = vld [vmem:[#allocation8 + $0x38] sm:$0xff] }
  0x3b   :  { %342 = vmatprep.subr.bf16.mxu0 %v341_v6  ;;  %346 = vmatprep.subr.bf16.mxu1 %v345_v11  ;;  %v353_v16 = vpack.c.bf16 %v173_v15, %v172_v14  ;;  %v357_v19 = vpack.c.bf16 %v175_v18, %v174_v17  ;;  %v285_v20 = vld [vmem:[%s576_s2] ss:$0 sm:$0xff]  ;;  %s470_s2 = smov [#allocation9]  }
  0x3c   :  { %348 = vmatpush3.bf16.msra.mxu1 %v345_v11  ;;  %v288_v29 = vld [vmem:[%s578_s4] ss:$0 sm:$0xff]  ;;  %s272_s9 = sshll.u32 %s470_s2, 4  ;;  %s273_s9 = int_to_ptr.vmem [resolvable:$true] %s272_s9 }
  0x3d   :  { %350 = vmatprep.subr.bf16.mxu1 %v349_v13  ;;  %s437_s10 = scalar_lea.vmem %s273_s9, 256  ;;  %p442_p11 = scmp.lt.s32.totalorder %s273_s9, %s273_s9 }
  0x3e   :  { %344 = vmatpush3.bf16.msra.mxu0 %v341_v6  ;;  %p438_p10 = scmp.ne.s32.totalorder %s273_s9, %s437_s10  ;;  %p443_p12 = scmp.lt.s32.totalorder %s437_s10, %s437_s10 }
  0x40   :  { %352 = vmatpush3.bf16.msra.mxu1 %v349_v13  ;;  %p444_p13 = por %p443_p12, %p442_p11 }
  0x41   :  { %316 = vmatmul.mubr.msk.f32.vlgmr.msra.gmra.mrb[0].mxu0 %vm79_vm0, %v67_v7  ;;  %354 = vmatprep.subr.bf16.mxu1 %v353_v16 }
  0x42   :  { %p445_p0 = pnand %p444_p13, %p438_p10 }
  0x44   :  { %356 = vmatpush3.bf16.msra.mxu1 %v353_v16 }
  0x45   :  { %358 = vmatprep.subr.bf16.mxu1 %v357_v19 }
  0x48   :  { %360 = vmatpush3.bf16.msra.mxu1 %v357_v19 }
 0x114   :  { %v317_v21 = vpop.f32.mrb[0].mxu0 }
 0x115   :  { %v158_v22 = vadd.f32 %v317_v21, %v285_v20  ;;  %v152_v23 = vpop.f32.mrb[1].mxu0 }
 0x116   :  { %v153_v24 = vadd.f32 %v285_v20, %v152_v23 }
 0x117   :  { %367 = vtanh.f32 %v158_v22 }
 0x118   :  { %369 = vtanh.f32 %v153_v24 }
 0x121   :  { %v368_v25 = vpop.eup %367 }
 0x122   :  { %v370_v26 = vpop.eup %369  ;;  %165 = vst.msk [vmem:[#allocation2 + $0x8] sm:$0xff] %vm163_vm1, %v368_v25 }
 0x123   :  { %164 = vst.msk [vmem:[#allocation2] sm:$0xff] %vm163_vm1, %v370_v26 }
 0x129   :  { %v167_v28 = vld [vmem:[#allocation2 + $0x8] sm:$0xff] }
 0x12a   :  { %v166_v27 = vld [vmem:[#allocation2] sm:$0xff] }
 0x12b   :  { %334 = vmatprep.mubr.msk.f32.mxu1 %vm163_vm1, %v166_v27 }
 0x12c   :  { %335 = vmatmul.mubr.msk.f32.vlgmr.msra.gmra.mrb[0].mxu1 %vm163_vm1, %v167_v28 }
 0x1ff   :  { %v336_v30 = vpop.f32.mrb[0].mxu1 }
 0x200   :  { %v262_v31 = vadd.f32 %v336_v30, %v288_v29  ;;  %v256_v32 = vpop.f32.mrb[1].mxu1 }
 0x201   :  { %v257_v33 = vadd.f32 %v288_v29, %v256_v32 }
 0x202   :  { %266 = vst [vmem:[#allocation9 + $0x8] sm:$0xff] %v262_v31 }
 0x203   :  { %265 = vst [vmem:[#allocation9] sm:$0xff] %v257_v33 }
 0x204   :  { %448 = shalt.err (!%p445_p0)
}
 0x205   :  { %s449_s4 = scalar_lea.hbm %s579_s5, 256 }
 0x206   :  { %p450_p1 = scmp.ne.s32.totalorder %s579_s5, %s449_s4  ;;  %p453_p2 = scmp.lt.u32.totalorder %s449_s4, %s579_s5 }
 0x208   :  { %p455_p3 = pnand %p453_p2, %p450_p1 }
 0x20a   :  { %458 = shalt.err (!%p455_p3)
}
 0x20b   :  { %278 = dma.vmem_to_hbm [thread:$0]  %s273_s9, 256, %s579_s5, [#allocation5], %s467_s30, %s467_s30, %s468_s6  }
 0x20c   :  { %463 = dma.done.wait [#allocation5], 256  }
 0x20d   :  { %464 = vsyncadd [#allocation5], 4294967040 }
 0x20e   :  { %282 = vsyncpa [#allocation4], 1 }
 0x20f   :  { %283 = vsyncpa [#allocation7], 1 }
 0x210   :  { %284 = vsyncpa [#allocation5], 1 }

</bundles_post_ra>
